<compile_context>
chip_gen: v6e
topology: v6e:2x2x1
jax: 0.10.0
libtpu: 0.0.40
codegen_flags: <defaults>
</compile_context>

<pallas_src>
import functools

import jax
import jax.numpy as jnp
from jax.experimental import pallas as pl
from jax.experimental.pallas import tpu as pltpu


def dqn_mlp_kernel(x_ref, w1_ref, b1_ref, w2_ref, b2_ref, w3_ref, b3_ref, o_ref,
                   *, bf16_epilogue=False):
    w_dtype = w1_ref.dtype
    # Epilogue (bias-add / ReLU) dtype: f32 everywhere by default (v5e-safe);
    # bf16 on v6e/v7x halves vreg pressure and skips two f32->bf16 pack passes.
    act_dtype = jnp.bfloat16 if bf16_epilogue else jnp.float32

    x = x_ref[...].astype(w_dtype)

    # Layer 1: (TB, 5) @ (5, 128).  K=5 is masked by Mosaic; the mostly-empty MXU
    # push co-issues behind layers 2/3, so a dot is fine here.
    h1 = jnp.dot(x, w1_ref[...], preferred_element_type=jnp.float32)
    h1 = jnp.maximum(h1.astype(act_dtype) + b1_ref[...].astype(act_dtype), 0)
    h1 = h1.astype(w_dtype)

    # Layer 2: (TB, 128) @ (128, 128)
    h2 = jnp.dot(h1, w2_ref[...], preferred_element_type=jnp.float32)
    h2 = jnp.maximum(h2.astype(act_dtype) + b2_ref[...].astype(act_dtype), 0)
    h2 = h2.astype(w_dtype)

    # Layer 3: (TB, 128) @ (128, 3) -> store the narrow (TB, 3) result directly.
    out = jnp.dot(h2, w3_ref[...], preferred_element_type=jnp.float32)
    o_ref[...] = (out + b3_ref[...].astype(jnp.float32)).astype(o_ref.dtype)


def _round_up(x, m):
    return ((x + m - 1) // m) * m


def _choose_tb(B, tb_max=2048):
    """Batch tile: as large as possible (amortize per-step overhead), but keep the
    grid >= 2 steps for big batches so both TensorCores get work on v7x."""
    b8 = _round_up(B, 8)
    if b8 <= tb_max:
        return b8
    n_tiles = max(2, pl.cdiv(b8, tb_max))
    return _round_up(pl.cdiv(b8, n_tiles), 8)


def dqn_forward(x, params, *, tb=None, bf16_epilogue=False):
    """y = ReLU(x@W1+b1) -> ReLU(.@W2+b2) -> .@W3+b3.  x: (B, 5) -> (B, 3)."""
    w1, b1, w2, b2, w3, b3 = params
    B, K = x.shape
    H = w1.shape[1]          # 128
    N = w3.shape[1]          # 3

    if tb is None:
        tb = _choose_tb(B)
    grid = (pl.cdiv(B, tb),)  # ragged last tile is clipped on writeback by Pallas

    # Weight-stationary: constant block index across the batch grid axis.
    resident = lambda a: pl.BlockSpec(a.shape, lambda i: (0, 0))

    bytes_accessed = sum(
        int(a.size) * a.dtype.itemsize for a in (x, w1, b1, w2, b2, w3, b3)
    ) + B * N * 4  # f32 output
    cost = pl.CostEstimate(
        flops=2 * B * (K * H + H * H + H * N),
        transcendentals=0,
        bytes_accessed=bytes_accessed,
    )

    kernel = functools.partial(dqn_mlp_kernel, bf16_epilogue=bf16_epilogue)

    return pl.pallas_call(
        kernel,
        out_shape=jax.ShapeDtypeStruct((B, N), jnp.float32),
        grid_spec=pltpu.PrefetchScalarGridSpec(
            num_scalar_prefetch=0,
            grid=grid,
            in_specs=[
                pl.BlockSpec((tb, K), lambda i: (i, 0)),   # streamed x tile, unpadded K
                resident(w1), resident(b1),
                resident(w2), resident(b2),
                resident(w3), resident(b3),
            ],
            out_specs=pl.BlockSpec((tb, N), lambda i: (i, 0)),  # narrow (B, 3) output
        ),
        compiler_params=pltpu.CompilerParams(
            dimension_semantics=("parallel",),  # batch tiles shard over 2 TCs on v7x
        ),
        cost_estimate=cost,
    )(x, w1, b1, w2, b2, w3, b3)


def init_params(key):
    """Deterministic init mirroring nn.Linear default: U(-1/sqrt(fan_in), +1/sqrt(fan_in))."""
    def linear(key, fan_in, fan_out):
        kw, kb = jax.random.split(key)
        bound = 1.0 / jnp.sqrt(jnp.float32(fan_in))
        w = jax.random.uniform(kw, (fan_in, fan_out), jnp.float32, -bound, bound)
        b = jax.random.uniform(kb, (1, fan_out), jnp.float32, -bound, bound)
        return w, b

    k1, k2, k3 = jax.random.split(key, 3)
    w1, b1 = linear(k1, 5, 128)
    w2, b2 = linear(k2, 128, 128)
    w3, b3 = linear(k3, 128, 3)
    return (w1, b1, w2, b2, w3, b3)


def cast_weights(params, dtype):
    """Cast weight matrices (not biases) to `dtype` for MXU-native matmuls."""
    w1, b1, w2, b2, w3, b3 = params
    return (w1.astype(dtype), b1, w2.astype(dtype), b2, w3.astype(dtype), b3)


if __name__ == "__main__":
    key = jax.random.PRNGKey(0)
    pkey, xkey = jax.random.split(key)
    params = init_params(pkey)

    B = 8  # small batch; wrapper picks a single (8, .) tile
    x = jax.random.normal(xkey, (B, 5), jnp.float32)

    fwd = jax.jit(functools.partial(dqn_forward, bf16_epilogue=False))

    # --- f32 weights path: tight check vs pure-JAX reference -----------------
    out_f32 = jax.block_until_ready(fwd(x, params))
    w1, b1, w2, b2, w3, b3 = params
    ref = jnp.maximum(x @ w1 + b1, 0.0)
    ref = jnp.maximum(ref @ w2 + b2, 0.0)
    ref = ref @ w3 + b3
    assert out_f32.shape == (B, 3)
    assert jnp.allclose(out_f32, ref, atol=1e-5, rtol=1e-5)

    # --- bf16 weights path (MXU-native, f32 accumulate + f32 epilogue) -------
    params_bf16 = cast_weights(params, jnp.bfloat16)
    out_bf16 = jax.block_until_ready(fwd(x, params_bf16))
    wd = jnp.bfloat16
    h = jnp.maximum(
        jnp.dot(x.astype(wd), w1.astype(wd), preferred_element_type=jnp.float32) + b1, 0.0
    ).astype(wd)
    h = jnp.maximum(
        jnp.dot(h, w2.astype(wd), preferred_element_type=jnp.float32) + b2, 0.0
    ).astype(wd)
    ref_bf16 = jnp.dot(h, w3.astype(wd), preferred_element_type=jnp.float32) + b3
    assert out_bf16.shape == (B, 3)
    assert jnp.allclose(out_bf16, ref_bf16, atol=2e-2, rtol=2e-2)

    print("KERNEL_OK")
</pallas_src>

<mosaic_0001>
module attributes {stable_mosaic.version = 11 : i64} {
  func.func @dqn_mlp_kernel(%arg0: i32, %arg1: memref<8x5xf32, #tpu.memory_space<vmem>>, %arg2: memref<5x128xf32, #tpu.memory_space<vmem>>, %arg3: memref<1x128xf32, #tpu.memory_space<vmem>>, %arg4: memref<128x128xf32, #tpu.memory_space<vmem>>, %arg5: memref<1x128xf32, #tpu.memory_space<vmem>>, %arg6: memref<128x3xf32, #tpu.memory_space<vmem>>, %arg7: memref<1x3xf32, #tpu.memory_space<vmem>>, %arg8: memref<8x3xf32, #tpu.memory_space<vmem>>) attributes {dimension_semantics = [#tpu.dimension_semantics<parallel>], iteration_bounds = array<i64: 1>, scalar_prefetch = 0 : i64, scratch_operands = 0 : i64, tpu.core_type = #tpu.core_type<tc>, window_params = [{transform_indices = @transform_0, window_bounds = array<i64: 8, 5>}, {pipeline_mode = #tpu.pipeline_mode<synchronous>, transform_indices = @transform_1, window_bounds = array<i64: 5, 128>}, {pipeline_mode = #tpu.pipeline_mode<synchronous>, transform_indices = @transform_2, window_bounds = array<i64: 1, 128>}, {pipeline_mode = #tpu.pipeline_mode<synchronous>, transform_indices = @transform_3, window_bounds = array<i64: 128, 128>}, {pipeline_mode = #tpu.pipeline_mode<synchronous>, transform_indices = @transform_4, window_bounds = array<i64: 1, 128>}, {pipeline_mode = #tpu.pipeline_mode<synchronous>, transform_indices = @transform_5, window_bounds = array<i64: 128, 3>}, {pipeline_mode = #tpu.pipeline_mode<synchronous>, transform_indices = @transform_6, window_bounds = array<i64: 1, 3>}, {transform_indices = @transform_7, window_bounds = array<i64: 8, 3>}]} {
    %c0 = arith.constant 0 : index
    %c0_0 = arith.constant 0 : index
    %0 = vector.load %arg1[%c0, %c0_0] : memref<8x5xf32, #tpu.memory_space<vmem>>, vector<8x5xf32>
    %c0_1 = arith.constant 0 : index
    %c0_2 = arith.constant 0 : index
    %1 = vector.load %arg2[%c0_1, %c0_2] : memref<5x128xf32, #tpu.memory_space<vmem>>, vector<5x128xf32>
    %cst = arith.constant dense<0.000000e+00> : vector<8x128xf32>
    %2 = tpu.matmul %0, %1, %cst {dimension_numbers = #tpu.dot_dimension_numbers<[1], [0], [0], [1], [0, 0, 1, 1], [], []>} : vector<8x5xf32>, vector<5x128xf32>, vector<8x128xf32> -> vector<8x128xf32>
    %c0_3 = arith.constant 0 : index
    %c0_4 = arith.constant 0 : index
    %3 = vector.load %arg3[%c0_3, %c0_4] : memref<1x128xf32, #tpu.memory_space<vmem>>, vector<1x128xf32>
    %4 = vector.broadcast %3 : vector<1x128xf32> to vector<8x128xf32>
    %5 = arith.addf %2, %4 : vector<8x128xf32>
    %cst_5 = arith.constant 0.000000e+00 : f32
    %6 = vector.broadcast %cst_5 : f32 to vector<8x128xf32>
    %7 = arith.maximumf %5, %6 : vector<8x128xf32>
    %c0_6 = arith.constant 0 : index
    %c0_7 = arith.constant 0 : index
    %8 = vector.load %arg4[%c0_6, %c0_7] : memref<128x128xf32, #tpu.memory_space<vmem>>, vector<128x128xf32>
    %cst_8 = arith.constant dense<0.000000e+00> : vector<8x128xf32>
    %9 = tpu.matmul %7, %8, %cst_8 {dimension_numbers = #tpu.dot_dimension_numbers<[1], [0], [0], [1], [0, 0, 1, 1], [], []>} : vector<8x128xf32>, vector<128x128xf32>, vector<8x128xf32> -> vector<8x128xf32>
    %c0_9 = arith.constant 0 : index
    %c0_10 = arith.constant 0 : index
    %10 = vector.load %arg5[%c0_9, %c0_10] : memref<1x128xf32, #tpu.memory_space<vmem>>, vector<1x128xf32>
    %11 = vector.broadcast %10 : vector<1x128xf32> to vector<8x128xf32>
    %12 = arith.addf %9, %11 : vector<8x128xf32>
    %cst_11 = arith.constant 0.000000e+00 : f32
    %13 = vector.broadcast %cst_11 : f32 to vector<8x128xf32>
    %14 = arith.maximumf %12, %13 : vector<8x128xf32>
    %c0_12 = arith.constant 0 : index
    %c0_13 = arith.constant 0 : index
    %15 = vector.load %arg6[%c0_12, %c0_13] : memref<128x3xf32, #tpu.memory_space<vmem>>, vector<128x3xf32>
    %cst_14 = arith.constant dense<0.000000e+00> : vector<8x3xf32>
    %16 = tpu.matmul %14, %15, %cst_14 {dimension_numbers = #tpu.dot_dimension_numbers<[1], [0], [0], [1], [0, 0, 1, 1], [], []>} : vector<8x128xf32>, vector<128x3xf32>, vector<8x3xf32> -> vector<8x3xf32>
    %c0_15 = arith.constant 0 : index
    %c0_16 = arith.constant 0 : index
    %17 = vector.load %arg7[%c0_15, %c0_16] : memref<1x3xf32, #tpu.memory_space<vmem>>, vector<1x3xf32>
    %18 = vector.broadcast %17 : vector<1x3xf32> to vector<8x3xf32>
    %19 = arith.addf %16, %18 : vector<8x3xf32>
    %c0_17 = arith.constant 0 : index
    %c0_18 = arith.constant 0 : index
    %20 = vector.load %arg8[%c0_17, %c0_18] : memref<8x3xf32, #tpu.memory_space<vmem>>, vector<8x3xf32>
    tpu.vector_store %arg8[%c0_17, %c0_18], %19 {strides = array<i32>} : memref<8x3xf32, #tpu.memory_space<vmem>>, vector<8x3xf32>,
    return
  }
  func.func @transform_0(%arg0: i32) -> (i32, i32) {
    %c0_i32 = arith.constant 0 : i32
    %c0_i32_0 = arith.constant 0 : i32
    return %arg0, %c0_i32 : i32, i32
  }
  func.func @transform_1(%arg0: i32) -> (i32, i32) {
    %c0_i32 = arith.constant 0 : i32
    %c0_i32_0 = arith.constant 0 : i32
    %c0_i32_1 = arith.constant 0 : i32
    return %c0_i32, %c0_i32_0 : i32, i32
  }
  func.func @transform_2(%arg0: i32) -> (i32, i32) {
    %c0_i32 = arith.constant 0 : i32
    %c0_i32_0 = arith.constant 0 : i32
    %c0_i32_1 = arith.constant 0 : i32
    return %c0_i32, %c0_i32_0 : i32, i32
  }
  func.func @transform_3(%arg0: i32) -> (i32, i32) {
    %c0_i32 = arith.constant 0 : i32
    %c0_i32_0 = arith.constant 0 : i32
    %c0_i32_1 = arith.constant 0 : i32
    return %c0_i32, %c0_i32_0 : i32, i32
  }
  func.func @transform_4(%arg0: i32) -> (i32, i32) {
    %c0_i32 = arith.constant 0 : i32
    %c0_i32_0 = arith.constant 0 : i32
    %c0_i32_1 = arith.constant 0 : i32
    return %c0_i32, %c0_i32_0 : i32, i32
  }
  func.func @transform_5(%arg0: i32) -> (i32, i32) {
    %c0_i32 = arith.constant 0 : i32
    %c0_i32_0 = arith.constant 0 : i32
    %c0_i32_1 = arith.constant 0 : i32
    return %c0_i32, %c0_i32_0 : i32, i32
  }
  func.func @transform_6(%arg0: i32) -> (i32, i32) {
    %c0_i32 = arith.constant 0 : i32
    %c0_i32_0 = arith.constant 0 : i32
    %c0_i32_1 = arith.constant 0 : i32
    return %c0_i32, %c0_i32_0 : i32, i32
  }
  func.func @transform_7(%arg0: i32) -> (i32, i32) {
    %c0_i32 = arith.constant 0 : i32
    %c0_i32_0 = arith.constant 0 : i32
    return %arg0, %c0_i32 : i32, i32
  }
}

</mosaic_0001>

<bundles_post_ra>
// kernel: dqn_forward.1
= control target key start
LH: loop header
LB: loop body
LE: loop exit
PB: predicated region body
PF: predicated region fallthrough
CT: control target
= control target key end

     0   :  { %12 = vsyncpa [#allocation3], 0  ;;  %s694_s0 = inlined_call_operand.vmem [shape: f32[8,5], index: 0, kind: input, shape index: {}]   ;;  %s695_s1 = inlined_call_operand.hbm [shape: f32[5,128], index: 1, kind: input, shape index: {}]   ;;  %s696_s2 = inlined_call_operand.vmem [shape: f32[1,128], index: 2, kind: input, shape index: {}]   ;;  %s697_s3 = inlined_call_operand.vmem [shape: f32[128,128], index: 3, kind: input, shape index: {}]   ;;  %s698_s4 = inlined_call_operand.hbm [shape: f32[1,128], index: 4, kind: input, shape index: {}]   ;;  %s699_s5 = inlined_call_operand.vmem [shape: f32[128,3], index: 5, kind: input, shape index: {}]   ;;  %s700_s6 = inlined_call_operand.vmem [shape: f32[1,3], index: 6, kind: input, shape index: {}]   ;;  %s701_s7 = inlined_call_operand.vmem [shape: f32[8,3], index: 7, kind: output, shape index: {}]  }
   0x1   :  { %13 = vsyncpa [#allocation5], 0  ;;  %s497_s24 = smov [#allocation2]   ;;  %s498_s26 = smov [#allocation4]  }
   0x2   :  { %s22_s25 = sshll.u32 %s497_s24, 4  ;;  %s36_s27 = sshll.u32 %s498_s26, 4  ;;  %s23_s25 = int_to_ptr.vmem [resolvable:$true] %s22_s25  ;;  %s37_s27 = int_to_ptr.vmem [resolvable:$true] %s36_s27 }
   0x3   :  { %s461_s28 = scalar_lea.vmem %s23_s25, 128  ;;  %p466_p1 = scmp.lt.s32.totalorder %s23_s25, %s23_s25 }
   0x4   :  { %p462_p0 = scmp.ne.s32.totalorder %s23_s25, %s461_s28  ;;  %p467_p2 = scmp.lt.s32.totalorder %s461_s28, %s461_s28 }
   0x6   :  { %p468_p3 = por %p467_p2, %p466_p1 }
   0x8   :  { %p469_p4 = pnand %p468_p3, %p462_p0 }
   0xa   :  { %472 = shalt.err (!%p469_p4)
}
   0xb   :  { %25 = dma.hbm_to_vmem [thread:$0]  %s695_s1, 128, %s23_s25, [#allocation3]  }
   0xc   :  { %s481_s8 = scalar_lea.vmem %s37_s27, 16  ;;  %s485_s9 = scalar_lea.vmem %s37_s27, 32 }
   0xd   :  { %p482_p5 = scmp.ne.s32.totalorder %s37_s27, %s481_s8  ;;  %p486_p6 = scmp.lt.s32.totalorder %s37_s27, %s37_s27 }
   0xe   :  { %p487_p7 = scmp.lt.s32.totalorder %s485_s9, %s481_s8 }
  0x10   :  { %p488_p8 = por %p487_p7, %p486_p6 }
  0x12   :  { %p489_p9 = pnand %p488_p8, %p482_p5 }
  0x14   :  { %492 = shalt.err (!%p489_p9)
}
  0x15   :  { %39 = dma.hbm_to_vmem [thread:$0]  %s698_s4, 16, %s37_s27, [#allocation5]  }
  0x16   :  { %493 = dma.done.wait [#allocation3], 128  }
  0x17   :  { %494 = vsyncadd [#allocation3], 4294967168 }
  0x18   :  { %495 = dma.done.wait [#allocation5], 16  }
  0x19   :  { %496 = vsyncadd [#allocation5], 4294967280  ;;  %v499_v0 = vmov 0.0   ;;  %vm500_vm0 = vmmov 0   ;;  %vm63_vm1 = vcmask 1044480   ;;  %vm59_vm2 = vcmask 39936  }
  0x1a   :  { %374 = vmatprep.subr.mxu0 %v499_v0  ;;  %376 = vmatprep.mubr.msk.f32.mxu0 %vm500_vm0, %v499_v0  ;;  %v51_v1 = vld [vmem:[#allocation2] sm:$0x1f]  ;;  %v153_v3 = vld [vmem:[%s697_s3 + $0x78] sm:$0xff]  ;;  %v152_v4 = vld [vmem:[%s697_s3 + $0x70] sm:$0xff]  ;;  %vm325_vm3 = vcmask 23552  }
  0x1b   :  { %379 = vmatprep.subr.mxu1 %v499_v0  ;;  %411 = vmatprep.mubr.msk.f32.mxu1 %vm500_vm0, %v499_v0  ;;  %v50_v2 = vld [vmem:[%s694_s0] sm:$0xff]  ;;  %v151_v5 = vld [vmem:[%s697_s3 + $0x68] sm:$0xff]  ;;  %v149_v7 = vld [vmem:[%s697_s3 + $0x58] sm:$0xff] }
  0x1c   :  { %375 = vmatpush3.msk.msra.mxu0 %vm63_vm1, %v51_v1  ;;  %380 = vmatpush3.msra.mxu1 %v153_v3  ;;  %v150_v6 = vld [vmem:[%s697_s3 + $0x60] sm:$0xff]  ;;  %v148_v8 = vld [vmem:[%s697_s3 + $0x50] sm:$0xff]  ;;  %v147_v9 = vld [vmem:[%s697_s3 + $0x48] sm:$0xff] }
  0x1d   :  { %377 = vmatmul.mubr.msk.f32.vlgmr.msra.gmra.mxu0 %vm59_vm2, %v50_v2  ;;  %381 = vmatprep.subr.mxu1 %v499_v0  ;;  %v146_v10 = vld [vmem:[%s697_s3 + $0x40] sm:$0xff]  ;;  %v145_v11 = vld [vmem:[%s697_s3 + $0x38] sm:$0xff]  ;;  %v144_v12 = vld [vmem:[%s697_s3 + $0x30] sm:$0xff] }
  0x1e   :  { %382 = vmatpush3.msra.mxu1 %v152_v4  ;;  %414 = vmatprep.subr.mxu0 %v499_v0  ;;  %v143_v13 = vld [vmem:[%s697_s3 + $0x28] sm:$0xff]  ;;  %v142_v14 = vld [vmem:[%s697_s3 + $0x20] sm:$0xff]  ;;  %v141_v15 = vld [vmem:[%s697_s3 + $0x18] sm:$0xff] }
  0x1f   :  { %383 = vmatprep.subr.mxu1 %v499_v0  ;;  %446 = vmatprep.mubr.msk.f32.mxu0 %vm500_vm0, %v499_v0  ;;  %v140_v16 = vld [vmem:[%s697_s3 + $0x10] sm:$0xff]  ;;  %v139_v17 = vld [vmem:[%s697_s3 + $0x8] sm:$0xff]  ;;  %v138_v18 = vld [vmem:[%s697_s3] sm:$0xff] }
  0x20   :  { %384 = vmatpush3.msra.mxu1 %v151_v5  ;;  %v247_v19 = vld [vmem:[%s699_s5 + $0x78] sm:$0xff]  ;;  %v246_v20 = vld [vmem:[%s699_s5 + $0x70] sm:$0xff]  ;;  %v245_v21 = vld [vmem:[%s699_s5 + $0x68] sm:$0xff] }
  0x21   :  { %385 = vmatprep.subr.mxu1 %v499_v0  ;;  %415 = vmatpush3.msra.mxu0 %v247_v19  ;;  %v244_v22 = vld [vmem:[%s699_s5 + $0x60] sm:$0xff]  ;;  %v243_v23 = vld [vmem:[%s699_s5 + $0x58] sm:$0xff]  ;;  %v242_v24 = vld [vmem:[%s699_s5 + $0x50] sm:$0xff] }
  0x22   :  { %386 = vmatpush3.msra.mxu1 %v150_v6  ;;  %416 = vmatprep.subr.mxu0 %v499_v0  ;;  %v241_v25 = vld [vmem:[%s699_s5 + $0x48] sm:$0xff]  ;;  %v240_v26 = vld [vmem:[%s699_s5 + $0x40] sm:$0xff]  ;;  %v239_v27 = vld [vmem:[%s699_s5 + $0x38] sm:$0xff] }
  0x23   :  { %387 = vmatprep.subr.mxu1 %v499_v0  ;;  %417 = vmatpush3.msra.mxu0 %v246_v20  ;;  %v238_v28 = vld [vmem:[%s699_s5 + $0x30] sm:$0xff]  ;;  %v237_v29 = vld [vmem:[%s699_s5 + $0x28] sm:$0xff]  ;;  %v236_v30 = vld [vmem:[%s699_s5 + $0x20] sm:$0xff] }
  0x24   :  { %388 = vmatpush3.msra.mxu1 %v149_v7  ;;  %418 = vmatprep.subr.mxu0 %v499_v0  ;;  %v235_v31 = vld [vmem:[%s699_s5 + $0x18] sm:$0xff]  ;;  %v333_v32 = vld [vmem:[%s696_s2] ss:$0 sm:$0xff]  ;;  %v234_v37 = vld [vmem:[%s699_s5 + $0x10] sm:$0xff] }
  0x25   :  { %389 = vmatprep.subr.mxu1 %v499_v0  ;;  %419 = vmatpush3.msra.mxu0 %v245_v21  ;;  %v233_v38 = vld [vmem:[%s699_s5 + $0x8] sm:$0xff]  ;;  %v232_v39 = vld [vmem:[%s699_s5] sm:$0xff] }
  0x26   :  { %390 = vmatpush3.msra.mxu1 %v148_v8  ;;  %420 = vmatprep.subr.mxu0 %v499_v0  ;;  %v336_v40 = vld [vmem:[#allocation4] ss:$0 sm:$0xff]  ;;  %v337_v45 = vld [vmem:[%s700_s6] ss:$0 sm:$0xff] }
  0x27   :  { %391 = vmatprep.subr.mxu1 %v499_v0  ;;  %421 = vmatpush3.msra.mxu0 %v244_v22 }
  0x28   :  { %392 = vmatpush3.msra.mxu1 %v147_v9  ;;  %422 = vmatprep.subr.mxu0 %v499_v0 }
  0x29   :  { %393 = vmatprep.subr.mxu1 %v499_v0  ;;  %423 = vmatpush3.msra.mxu0 %v243_v23 }
  0x2a   :  { %394 = vmatpush3.msra.mxu1 %v146_v10  ;;  %424 = vmatprep.subr.mxu0 %v499_v0 }
  0x2b   :  { %395 = vmatprep.subr.mxu1 %v499_v0  ;;  %425 = vmatpush3.msra.mxu0 %v242_v24 }
  0x2c   :  { %396 = vmatpush3.msra.mxu1 %v145_v11  ;;  %426 = vmatprep.subr.mxu0 %v499_v0 }
  0x2d   :  { %397 = vmatprep.subr.mxu1 %v499_v0  ;;  %427 = vmatpush3.msra.mxu0 %v241_v25 }
  0x2e   :  { %398 = vmatpush3.msra.mxu1 %v144_v12  ;;  %428 = vmatprep.subr.mxu0 %v499_v0 }
  0x2f   :  { %399 = vmatprep.subr.mxu1 %v499_v0  ;;  %429 = vmatpush3.msra.mxu0 %v240_v26 }
  0x30   :  { %400 = vmatpush3.msra.mxu1 %v143_v13  ;;  %430 = vmatprep.subr.mxu0 %v499_v0 }
  0x31   :  { %401 = vmatprep.subr.mxu1 %v499_v0  ;;  %431 = vmatpush3.msra.mxu0 %v239_v27 }
  0x32   :  { %402 = vmatpush3.msra.mxu1 %v142_v14  ;;  %432 = vmatprep.subr.mxu0 %v499_v0 }
  0x33   :  { %403 = vmatprep.subr.mxu1 %v499_v0  ;;  %433 = vmatpush3.msra.mxu0 %v238_v28 }
  0x34   :  { %404 = vmatpush3.msra.mxu1 %v141_v15  ;;  %434 = vmatprep.subr.mxu0 %v499_v0 }
  0x35   :  { %405 = vmatprep.subr.mxu1 %v499_v0  ;;  %435 = vmatpush3.msra.mxu0 %v237_v29 }
  0x36   :  { %406 = vmatpush3.msra.mxu1 %v140_v16  ;;  %436 = vmatprep.subr.mxu0 %v499_v0 }
  0x37   :  { %407 = vmatprep.subr.mxu1 %v499_v0  ;;  %437 = vmatpush3.msra.mxu0 %v236_v30 }
  0x38   :  { %408 = vmatpush3.msra.mxu1 %v139_v17  ;;  %438 = vmatprep.subr.mxu0 %v499_v0 }
  0x39   :  { %409 = vmatprep.subr.mxu1 %v499_v0  ;;  %439 = vmatpush3.msra.mxu0 %v235_v31 }
  0x3a   :  { %410 = vmatpush3.msra.mxu1 %v138_v18  ;;  %440 = vmatprep.subr.mxu0 %v499_v0 }
  0x3b   :  { %441 = vmatpush3.msra.mxu0 %v234_v37 }
  0x3c   :  { %442 = vmatprep.subr.mxu0 %v499_v0 }
  0x3d   :  { %443 = vmatpush3.msra.mxu0 %v233_v38 }
  0x3e   :  { %444 = vmatprep.subr.mxu0 %v499_v0 }
  0x3f   :  { %445 = vmatpush3.msra.mxu0 %v232_v39 }
  0xdd   :  { %v133_v33 = vpop.f32.mrf.mxu0 }
  0xde   :  { %v134_v34 = vadd.f32 %v333_v32, %v133_v33 }
  0xdf   :  { %v378_v35 = vpop.f32.mrf.mxu0 }
  0xe0   :  { %v137_v36 = vmax.f32 %v134_v34, 0.0 }
  0xe2   :  { %412 = vmatmul.mubr.f32.vlgmr.msra.gmra.mxu1 %v137_v36 }
 0x1a2   :  { %v227_v41 = vpop.f32.mrf.mxu1 }
 0x1a3   :  { %v228_v42 = vadd.f32 %v336_v40, %v227_v41 }
 0x1a4   :  { %v413_v43 = vpop.f32.mrf.mxu1 }
 0x1a5   :  { %v231_v44 = vmax.f32 %v228_v42, 0.0 }
 0x1a7   :  { %447 = vmatmul.mubr.f32.vlgmr.msra.gmra.mxu0 %v231_v44 }
 0x267   :  { %v321_v46 = vpop.f32.mrf.mxu0 }
 0x268   :  { %v322_v47 = vadd.f32 %v337_v45, %v321_v46 }
 0x269   :  { %v448_v48 = vpop.f32.mrf.mxu0 }
 0x26a   :  { %326 = vst.msk [vmem:[%s701_s7] sm:$0xff] %vm325_vm3, %v322_v47 }
 0x26b   :  { %331 = vsyncpa [#allocation3], 1 }
 0x26c   :  { %332 = vsyncpa [#allocation5], 1 }

</bundles_post_ra>
